<compile_context>
chip_gen: v7x
topology: tpu7x:2x2x1
jax: 0.10.0
libtpu: 0.0.40
codegen_flags: <defaults>
</compile_context>

<pallas_src>
import functools

import jax
import jax.numpy as jnp
from jax.experimental import pallas as pl
from jax.experimental.pallas import tpu as pltpu

NUM_STATE = 2        # MountainCar-v0 observation dim
NUM_ACTION = 3       # MountainCar-v0 action dim
HIDDEN = 100

IN_PAD = 8           # NUM_STATE padded to a full sublane group (K of layer 1)
HIDDEN_PAD = 128     # HIDDEN padded to a full lane width
OUT_PAD = 8          # NUM_ACTION padded to a sublane group (small writeback slab)
MAX_TILE_B = 1024    # largest batch tile (amortizes ~0.35 us per grid step)


def _mlp_kernel(x_ref, w1_ref, b1_ref, w2_ref, b2_ref, o_ref):
    # x_ref: (TB, 8) f32, zero-padded beyond NUM_STATE columns.
    # Parameters are zero-padded lane/sublane-dense tiles, so padded hidden
    # lanes / output columns come out exactly zero.
    # Layer 1: (TB,8) x (8,128) MXU matmul, bias as the accumulator init.
    h = b1_ref[...] + jnp.dot(x_ref[...], w1_ref[...],
                              preferred_element_type=jnp.float32)
    h = jnp.maximum(h, 0.0)                                   # ReLU
    # Layer 2: (TB,128) x (128,8) MXU matmul, bias folded in.
    o_ref[...] = (b2_ref[...]
                  + jnp.dot(h, w2_ref[...], preferred_element_type=jnp.float32)
                  ).astype(o_ref.dtype)
    # TODO(synk): add a fused B=1 argmax (action-selection) variant and a
    # Q(s,a) gather variant (actions via scalar prefetch) so those callers
    # avoid emitting the Q slab entirely.


def pad_params(w1, b1, w2, b2):
    """Zero-pad parameters to TPU-friendly shapes (done once, outside the kernel).

    w1: (NUM_STATE, HIDDEN), b1: (HIDDEN,) or (1, HIDDEN)
    w2: (HIDDEN, NUM_ACTION), b2: (NUM_ACTION,) or (1, NUM_ACTION)
    """
    w1 = jnp.asarray(w1, jnp.float32).reshape(NUM_STATE, HIDDEN)
    b1 = jnp.asarray(b1, jnp.float32).reshape(1, HIDDEN)
    w2 = jnp.asarray(w2, jnp.float32).reshape(HIDDEN, NUM_ACTION)
    b2 = jnp.asarray(b2, jnp.float32).reshape(1, NUM_ACTION)
    w1_p = jnp.zeros((IN_PAD, HIDDEN_PAD), jnp.float32).at[:NUM_STATE, :HIDDEN].set(w1)
    b1_p = jnp.zeros((1, HIDDEN_PAD), jnp.float32).at[:, :HIDDEN].set(b1)
    w2_p = jnp.zeros((HIDDEN_PAD, OUT_PAD), jnp.float32).at[:HIDDEN, :NUM_ACTION].set(w2)
    b2_p = jnp.zeros((1, OUT_PAD), jnp.float32).at[:, :NUM_ACTION].set(b2)
    return w1_p, b1_p, w2_p, b2_p


@functools.partial(jax.jit, static_argnames=("tile_b",))
def _net_forward_padded(x_pad, w1_p, b1_p, w2_p, b2_p, *, tile_b):
    b_pad = x_pad.shape[0]
    grid = (b_pad // tile_b,)
    return pl.pallas_call(
        _mlp_kernel,
        out_shape=jax.ShapeDtypeStruct((b_pad, OUT_PAD), jnp.float32),
        grid=grid,
        in_specs=[
            pl.BlockSpec((tile_b, IN_PAD), lambda i: (i, 0)),         # x batch tile
            pl.BlockSpec((IN_PAD, HIDDEN_PAD), lambda i: (0, 0)),     # W1 (padded)
            pl.BlockSpec((1, HIDDEN_PAD), lambda i: (0, 0)),          # b1 (padded)
            pl.BlockSpec((HIDDEN_PAD, OUT_PAD), lambda i: (0, 0)),    # W2 (padded)
            pl.BlockSpec((1, OUT_PAD), lambda i: (0, 0)),             # b2 (padded)
        ],
        out_specs=pl.BlockSpec((tile_b, OUT_PAD), lambda i: (i, 0)),  # 8-wide Q slab
        compiler_params=pltpu.CompilerParams(
            dimension_semantics=("parallel",)),
    )(x_pad, w1_p, b1_p, w2_p, b2_p)


def _batch_bucket(B):
    """Power-of-two batch buckets (>= 8) keep the jit/Mosaic compile cache hot."""
    b_pad = max(8, pl.next_power_of_2(B))
    if b_pad <= 512:
        tile_b = b_pad                       # single block, minimal overhead
    else:
        tile_b = min(MAX_TILE_B, b_pad // 2)  # >=2 grid steps -> both TCs on v7x
    return b_pad, tile_b


def net_forward(x, w1_p, b1_p, w2_p, b2_p):
    """Forward pass. x: (B, NUM_STATE) float -> (B, NUM_ACTION) float32."""
    x = jnp.asarray(x, jnp.float32)
    B = x.shape[0]
    b_pad, tile_b = _batch_bucket(B)
    # One pad covers both the batch bucket and the K-dim pad for the MXU layer 1.
    x_pad = jnp.pad(x, ((0, b_pad - B), (0, IN_PAD - NUM_STATE)))
    out = _net_forward_padded(x_pad, w1_p, b1_p, w2_p, b2_p, tile_b=tile_b)
    return out[:B, :NUM_ACTION]


def init_params(key):
    """Mimics PyTorch nn.Linear default init: U(-1/sqrt(fan_in), 1/sqrt(fan_in))."""
    k1, k2, k3, k4 = jax.random.split(key, 4)
    bound1 = 1.0 / jnp.sqrt(jnp.float32(NUM_STATE))
    bound2 = 1.0 / jnp.sqrt(jnp.float32(HIDDEN))
    w1 = jax.random.uniform(k1, (NUM_STATE, HIDDEN), jnp.float32, -bound1, bound1)
    b1 = jax.random.uniform(k2, (1, HIDDEN), jnp.float32, -bound1, bound1)
    w2 = jax.random.uniform(k3, (HIDDEN, NUM_ACTION), jnp.float32, -bound2, bound2)
    b2 = jax.random.uniform(k4, (1, NUM_ACTION), jnp.float32, -bound2, bound2)
    return w1, b1, w2, b2


if __name__ == "__main__":
    key = jax.random.PRNGKey(0)
    pkey, xkey1, xkey2 = jax.random.split(key, 3)
    w1, b1, w2, b2 = init_params(pkey)
    params = pad_params(w1, b1, w2, b2)

    def ref(x):
        h = jnp.maximum(
            jnp.dot(x, w1, precision=jax.lax.Precision.HIGHEST) + b1, 0.0)
        return jnp.dot(h, w2, precision=jax.lax.Precision.HIGHEST) + b2

    # Tolerance deliberately loosened: the kernel uses default MXU precision
    # while the reference uses Precision.HIGHEST (per review guidance).
    TOL = 1e-3

    # Small env-step style batch (single-block path, bucket = 8).
    x_small = jax.random.normal(xkey1, (2, NUM_STATE), jnp.float32)
    out_small = jax.block_until_ready(net_forward(x_small, *params))
    assert out_small.shape == (2, NUM_ACTION)
    assert jnp.allclose(out_small, ref(x_small), atol=TOL, rtol=TOL)

    # Replay-buffer style batch (B=300 -> bucket 512, exercises batch padding
    # + row/column slicing of the 8-wide Q slab).
    x_big = jax.random.normal(xkey2, (300, NUM_STATE), jnp.float32)
    out_big = jax.block_until_ready(net_forward(x_big, *params))
    assert out_big.shape == (300, NUM_ACTION)
    assert jnp.allclose(out_big, ref(x_big), atol=TOL, rtol=TOL)

    print("KERNEL_OK")
</pallas_src>

<mosaic_0001>
module attributes {stable_mosaic.version = 11 : i64} {
  func.func @_mlp_kernel(%arg0: i32, %arg1: memref<8x8xf32, #tpu.memory_space<vmem>>, %arg2: memref<8x128xf32, #tpu.memory_space<vmem>>, %arg3: memref<1x128xf32, #tpu.memory_space<vmem>>, %arg4: memref<128x8xf32, #tpu.memory_space<vmem>>, %arg5: memref<1x8xf32, #tpu.memory_space<vmem>>, %arg6: memref<8x8xf32, #tpu.memory_space<vmem>>) attributes {dimension_semantics = [#tpu.dimension_semantics<parallel>], iteration_bounds = array<i64: 1>, scalar_prefetch = 0 : i64, scratch_operands = 0 : i64, tpu.core_type = #tpu.core_type<tc>, window_params = [{transform_indices = @transform_0, window_bounds = array<i64: 8, 8>}, {pipeline_mode = #tpu.pipeline_mode<synchronous>, transform_indices = @transform_1, window_bounds = array<i64: 8, 128>}, {pipeline_mode = #tpu.pipeline_mode<synchronous>, transform_indices = @transform_2, window_bounds = array<i64: 1, 128>}, {pipeline_mode = #tpu.pipeline_mode<synchronous>, transform_indices = @transform_3, window_bounds = array<i64: 128, 8>}, {pipeline_mode = #tpu.pipeline_mode<synchronous>, transform_indices = @transform_4, window_bounds = array<i64: 1, 8>}, {transform_indices = @transform_5, window_bounds = array<i64: 8, 8>}]} {
    %c0 = arith.constant 0 : index
    %c0_0 = arith.constant 0 : index
    %0 = vector.load %arg3[%c0, %c0_0] : memref<1x128xf32, #tpu.memory_space<vmem>>, vector<1x128xf32>
    %c0_1 = arith.constant 0 : index
    %c0_2 = arith.constant 0 : index
    %1 = vector.load %arg1[%c0_1, %c0_2] : memref<8x8xf32, #tpu.memory_space<vmem>>, vector<8x8xf32>
    %c0_3 = arith.constant 0 : index
    %c0_4 = arith.constant 0 : index
    %2 = vector.load %arg2[%c0_3, %c0_4] : memref<8x128xf32, #tpu.memory_space<vmem>>, vector<8x128xf32>
    %cst = arith.constant dense<0.000000e+00> : vector<8x128xf32>
    %3 = tpu.matmul %1, %2, %cst {dimension_numbers = #tpu.dot_dimension_numbers<[1], [0], [0], [1], [0, 0, 1, 1], [], []>} : vector<8x8xf32>, vector<8x128xf32>, vector<8x128xf32> -> vector<8x128xf32>
    %4 = vector.broadcast %0 : vector<1x128xf32> to vector<8x128xf32>
    %5 = arith.addf %4, %3 : vector<8x128xf32>
    %cst_5 = arith.constant 0.000000e+00 : f32
    %6 = vector.broadcast %cst_5 : f32 to vector<8x128xf32>
    %7 = arith.maximumf %5, %6 : vector<8x128xf32>
    %c0_6 = arith.constant 0 : index
    %c0_7 = arith.constant 0 : index
    %8 = vector.load %arg5[%c0_6, %c0_7] : memref<1x8xf32, #tpu.memory_space<vmem>>, vector<1x8xf32>
    %c0_8 = arith.constant 0 : index
    %c0_9 = arith.constant 0 : index
    %9 = vector.load %arg4[%c0_8, %c0_9] : memref<128x8xf32, #tpu.memory_space<vmem>>, vector<128x8xf32>
    %cst_10 = arith.constant dense<0.000000e+00> : vector<8x8xf32>
    %10 = tpu.matmul %7, %9, %cst_10 {dimension_numbers = #tpu.dot_dimension_numbers<[1], [0], [0], [1], [0, 0, 1, 1], [], []>} : vector<8x128xf32>, vector<128x8xf32>, vector<8x8xf32> -> vector<8x8xf32>
    %11 = vector.broadcast %8 : vector<1x8xf32> to vector<8x8xf32>
    %12 = arith.addf %11, %10 : vector<8x8xf32>
    %c0_11 = arith.constant 0 : index
    %c0_12 = arith.constant 0 : index
    %13 = vector.load %arg6[%c0_11, %c0_12] : memref<8x8xf32, #tpu.memory_space<vmem>>, vector<8x8xf32>
    tpu.vector_store %arg6[%c0_11, %c0_12], %12 {strides = array<i32>} : memref<8x8xf32, #tpu.memory_space<vmem>>, vector<8x8xf32>,
    return
  }
  func.func @transform_0(%arg0: i32) -> (i32, i32) {
    %c0_i32 = arith.constant 0 : i32
    %c0_i32_0 = arith.constant 0 : i32
    return %arg0, %c0_i32 : i32, i32
  }
  func.func @transform_1(%arg0: i32) -> (i32, i32) {
    %c0_i32 = arith.constant 0 : i32
    %c0_i32_0 = arith.constant 0 : i32
    %c0_i32_1 = arith.constant 0 : i32
    return %c0_i32, %c0_i32_0 : i32, i32
  }
  func.func @transform_2(%arg0: i32) -> (i32, i32) {
    %c0_i32 = arith.constant 0 : i32
    %c0_i32_0 = arith.constant 0 : i32
    %c0_i32_1 = arith.constant 0 : i32
    return %c0_i32, %c0_i32_0 : i32, i32
  }
  func.func @transform_3(%arg0: i32) -> (i32, i32) {
    %c0_i32 = arith.constant 0 : i32
    %c0_i32_0 = arith.constant 0 : i32
    %c0_i32_1 = arith.constant 0 : i32
    return %c0_i32, %c0_i32_0 : i32, i32
  }
  func.func @transform_4(%arg0: i32) -> (i32, i32) {
    %c0_i32 = arith.constant 0 : i32
    %c0_i32_0 = arith.constant 0 : i32
    %c0_i32_1 = arith.constant 0 : i32
    return %c0_i32, %c0_i32_0 : i32, i32
  }
  func.func @transform_5(%arg0: i32) -> (i32, i32) {
    %c0_i32 = arith.constant 0 : i32
    %c0_i32_0 = arith.constant 0 : i32
    return %arg0, %c0_i32 : i32, i32
  }
}

</mosaic_0001>

<bundles_post_ra>
// kernel: _net_forward_padded.1
= control target key start
LH: loop header
LB: loop body
LE: loop exit
PB: predicated region body
PF: predicated region fallthrough
CT: control target
= control target key end

     0   :  { %vm24_vm0 = vcmask 64512   ;;  %v329_v2 = vmov 0.0   ;;  %vm330_vm1 = vmmov 0   ;;  %v331_v6 = vmov 0.0|0.0   ;;  %s437_s0 = inlined_call_operand.vmem [shape: f32[8,8], index: 0, kind: input, shape index: {}]   ;;  %s438_s1 = inlined_call_operand.vmem [shape: f32[8,128], index: 1, kind: input, shape index: {}]   ;;  %s439_s2 = inlined_call_operand.vmem [shape: f32[1,128], index: 2, kind: input, shape index: {}]   ;;  %s440_s3 = inlined_call_operand.vmem [shape: f32[128,8], index: 3, kind: input, shape index: {}]   ;;  %s441_s4 = inlined_call_operand.vmem [shape: f32[1,8], index: 4, kind: input, shape index: {}]   ;;  %s442_s5 = inlined_call_operand.hbm [shape: f32[8,8], index: 5, kind: output, shape index: {}]  }
   0x1   :  { %v23_v0 = vld [vmem:[%s438_s1] sm:$0xff]  ;;  %237 = vmatprep.subr.mxu0 %v329_v2  ;;  %239 = vmatprep.mubr.msk.f32.mxu0 %vm330_vm1, %v329_v2  ;;  %v108_v4 = vld [vmem:[%s440_s3 + $0x8] sm:$0xff]  ;;  %v109_v5 = vld [vmem:[%s440_s3 + $0x10] sm:$0xff] }
   0x2   :  { %v22_v1 = vld [vmem:[%s437_s0] sm:$0xff]  ;;  %238 = vmatpush3.msra.mxu0 %v23_v0  ;;  %277 = vmatprep.subr.bf16.mxu1 %v331_v6  ;;  %v110_v8 = vld [vmem:[%s440_s3 + $0x18] sm:$0xff]  ;;  %v112_v11 = vld [vmem:[%s440_s3 + $0x28] sm:$0xff] }
   0x3   :  { %v107_v3 = vld [vmem:[%s440_s3] sm:$0xff]  ;;  %240 = vmatmul.mubr.msk.f32.vlgmr.msra.gmra.mrb[0].mxu0 %vm24_vm0, %v22_v1  ;;  %274 = vmatprep.mubr.msk.f32.mxu1 %vm330_vm1, %v329_v2  ;;  %v281_v9 = vpack.c.bf16 %v110_v8, %v109_v5 }
   0x4   :  { %v278_v7 = vpack.c.bf16 %v108_v4, %v107_v3  ;;  %v111_v10 = vld [vmem:[%s440_s3 + $0x20] sm:$0xff] }
   0x6   :  { %279 = vmatpush3.bf16.msra.mxu1 %v278_v7 }
   0x7   :  { %280 = vmatprep.subr.bf16.mxu1 %v331_v6 }
   0x8   :  { %10 = vsyncpa [#allocation3], 0  ;;  %v284_v12 = vpack.c.bf16 %v112_v11, %v111_v10  ;;  %v113_v13 = vld [vmem:[%s440_s3 + $0x30] sm:$0xff]  ;;  %v114_v14 = vld [vmem:[%s440_s3 + $0x38] sm:$0xff]  ;;  %s332_s29 = smov [#allocation2]  }
   0x9   :  { %v287_v15 = vpack.c.bf16 %v114_v14, %v113_v13  ;;  %v115_v16 = vld [vmem:[%s440_s3 + $0x40] sm:$0xff]  ;;  %v116_v17 = vld [vmem:[%s440_s3 + $0x48] sm:$0xff]  ;;  %v117_v19 = vld [vmem:[%s440_s3 + $0x50] sm:$0xff]  ;;  %s207_s30 = sshll.u32 %s332_s29, 4  ;;  %s208_s30 = int_to_ptr.vmem [resolvable:$true] %s207_s30 }
   0xa   :  { %282 = vmatpush3.bf16.msra.mxu1 %v281_v9  ;;  %v290_v18 = vpack.c.bf16 %v116_v17, %v115_v16  ;;  %v118_v20 = vld [vmem:[%s440_s3 + $0x58] sm:$0xff]  ;;  %v119_v22 = vld [vmem:[%s440_s3 + $0x60] sm:$0xff]  ;;  %v120_v23 = vld [vmem:[%s440_s3 + $0x68] sm:$0xff]  ;;  %p310_p1 = scmp.lt.s32.totalorder %s208_s30, %s208_s30 }
   0xb   :  { %283 = vmatprep.subr.bf16.mxu1 %v331_v6  ;;  %v293_v21 = vpack.c.bf16 %v118_v20, %v117_v19  ;;  %v296_v24 = vpack.c.bf16 %v120_v23, %v119_v22  ;;  %v121_v25 = vld [vmem:[%s440_s3 + $0x70] sm:$0xff]  ;;  %v122_v26 = vld [vmem:[%s440_s3 + $0x78] sm:$0xff]  ;;  %v216_v28 = vld [vmem:[%s439_s2] ss:$0 sm:$0xff]  ;;  %s305_s3 = scalar_lea.vmem %s208_s30, 128 }
   0xc   :  { %v299_v27 = vpack.c.bf16 %v122_v26, %v121_v25  ;;  %v217_v33 = vld [vmem:[%s441_s4] ss:$0 sm:$0xff]  ;;  %p306_p0 = scmp.ne.s32.totalorder %s208_s30, %s305_s3  ;;  %p311_p2 = scmp.lt.s32.totalorder %s305_s3, %s305_s3 }
   0xe   :  { %285 = vmatpush3.bf16.msra.mxu1 %v284_v12  ;;  %p312_p3 = por %p311_p2, %p310_p1 }
   0xf   :  { %286 = vmatprep.subr.bf16.mxu1 %v331_v6 }
  0x10   :  { %p313_p4 = pnand %p312_p3, %p306_p0 }
  0x12   :  { %288 = vmatpush3.bf16.msra.mxu1 %v287_v15 }
  0x13   :  { %289 = vmatprep.subr.bf16.mxu1 %v331_v6 }
  0x16   :  { %291 = vmatpush3.bf16.msra.mxu1 %v290_v18 }
  0x17   :  { %292 = vmatprep.subr.bf16.mxu1 %v331_v6 }
  0x1a   :  { %294 = vmatpush3.bf16.msra.mxu1 %v293_v21 }
  0x1b   :  { %295 = vmatprep.subr.bf16.mxu1 %v331_v6 }
  0x1e   :  { %297 = vmatpush3.bf16.msra.mxu1 %v296_v24 }
  0x1f   :  { %298 = vmatprep.subr.bf16.mxu1 %v331_v6 }
  0x22   :  { %300 = vmatpush3.bf16.msra.mxu1 %v299_v27 }
  0xd6   :  { %v94_v29 = vpop.f32.mrb[0].mxu0 }
  0xd7   :  { %v104_v30 = vadd.f32 %v216_v28, %v94_v29  ;;  %v241_v31 = vpop.f32.mrb[1].mxu0 }
  0xd9   :  { %v105_v32 = vmax.f32 %v104_v30, 0.0 }
  0xdb   :  { %275 = vmatmul.mubr.f32.vlgmr.msra.gmra.mrb[0].mxu1 %v105_v32 }
 0x1ae   :  { %v189_v34 = vpop.f32.mrb[0].mxu1 }
 0x1af   :  { %v199_v35 = vadd.f32 %v217_v33, %v189_v34  ;;  %v276_v36 = vpop.f32.mrb[1].mxu1 }
 0x1b1   :  { %200 = vst.msk [vmem:[#allocation2] sm:$0xff] %vm24_vm0, %v199_v35 }
 0x1b2   :  { %316 = shalt.err (!%p313_p4)
}
 0x1b3   :  { %s317_s7 = scalar_lea.hbm %s442_s5, 128 }
 0x1b4   :  { %p318_p5 = scmp.ne.s32.totalorder %s442_s5, %s317_s7  ;;  %p321_p6 = scmp.lt.u32.totalorder %s317_s7, %s442_s5 }
 0x1b6   :  { %p323_p7 = pnand %p321_p6, %p318_p5 }
 0x1b8   :  { %326 = shalt.err (!%p323_p7)
}
 0x1b9   :  { %210 = dma.vmem_to_hbm [thread:$0]  %s208_s30, 128, %s442_s5, [#allocation3]  }
 0x1ba   :  { %327 = dma.done.wait [#allocation3], 128  }
 0x1bb   :  { %328 = vsyncadd [#allocation3], 4294967168 }
 0x1bc   :  { %214 = vsyncpa [#allocation3], 1 }

</bundles_post_ra>
